<compile_context>
chip_gen: v7x
topology: tpu7x:2x2x1
jax: 0.10.0
libtpu: 0.0.40
codegen_flags: <defaults>
</compile_context>

<pallas_src>
import functools
import math

import jax
import jax.numpy as jnp
from jax.experimental import pallas as pl
from jax.experimental.pallas import tpu as pltpu

_RCE_K = -math.log(1e-4)        # -log(clamp(one_hot=0, 1e-4, 1)) = 9.2103...
_VMEM_LIMIT = 32 * 1024 * 1024  # = scoped default on v6e/v7x, raises v5e 16->32


def _round_up(x, m):
    return (x + m - 1) // m * m


# ---------------------------------------------------------------------------
# Fast path: num_classes == 2, interleaved lane layout, closed-form SCE.
# ---------------------------------------------------------------------------
def _sce2_kernel(pred_ref, lab_ref, expand_ref, out_ref, *,
                 alpha, beta, valid_rows, tile_rows):
    i = pl.program_id(0)

    x = pred_ref[...].astype(jnp.float32)            # (T, 256) interleaved
    lab = lab_ref[...]                                # (T, 128) int32 labels

    # Expand compact labels onto the interleaved lane layout via the idle MXU:
    # lab_exp[a, q] == labels[128*row_a + q // 2]  (exact: values are 0/1/-1).
    lab_bf = lab.astype(jnp.float32).astype(jnp.bfloat16)
    lab_exp = jnp.dot(lab_bf, expand_ref[...],
                      preferred_element_type=jnp.float32)   # (T, 256)

    t = x.shape[0]
    # Mask rows past the true array extent (partial last grid block).
    row_ids = i * tile_rows + jax.lax.broadcasted_iota(jnp.int32, (t, 1), 0)
    row_ok = row_ids < valid_rows                     # (T, 1) bool

    # Per-lane class parity and a convention-free "which roll reaches my pair
    # partner (lane ^ 1)" probe: works for either pltpu.roll sign convention.
    lane = jax.lax.broadcasted_iota(jnp.int32, (1, 128), 1)
    parity_i = lane & 1                               # (1, 128) int {0,1}
    partner_idx = lane + 1 - 2 * parity_i             # == lane ^ 1
    use_r127 = pltpu.roll(lane, 127, 1) == partner_idx  # (1, 128) bool
    parity_f = parity_i.astype(jnp.float32)

    ka = float(alpha)
    kb = float(beta) * _RCE_K

    partial = jnp.float32(0.0)
    for h in range(2):                                # two 128-lane halves
        xh = x[:, h * 128:(h + 1) * 128]              # (T, 128)
        lh = lab_exp[:, h * 128:(h + 1) * 128]        # (T, 128) label per lane
        # Pair partner (other class of the same sample) via lane rotation.
        partner = jnp.where(use_r127,
                            pltpu.roll(xh, 127, 1),
                            pltpu.roll(xh, 1, 1))
        d = partner - xh                              # z_other - z_this
        e = jnp.exp(-jnp.abs(d))                      # EUP
        log1pe = jnp.log(1.0 + e)                     # EUP
        sp = jnp.maximum(d, 0.0) + log1pe             # softplus(d) = CE_n
        sig = jnp.exp(-(sp - d))                      # sigmoid(d)  = p_other
        contrib = ka * sp + kb * jnp.maximum(sig, 1e-7)
        # Keep only lanes whose class equals their sample's label (padded
        # samples carry label -1 and never match); drop out-of-range rows.
        keep = (lh == parity_f) & row_ok
        partial = partial + jnp.sum(jnp.where(keep, contrib, 0.0))

    out_ref[0, 0] = partial


def _sce_loss_binary(pred, labels, alpha, beta, tile_rows_max):
    n = pred.shape[0]
    a_rows = pl.cdiv(n, 128)                          # 128 samples per row
    n_pad = a_rows * 128

    labels_i32 = labels.astype(jnp.int32)
    flat = pred.reshape(-1)
    if n_pad != n:                                    # only copy when unaligned
        flat = jnp.pad(flat, (0, (n_pad - n) * 2))
        labels_i32 = jnp.pad(labels_i32, (0, n_pad - n), constant_values=-1)
    pred2d = flat.reshape(a_rows, 256)                # interleaved (sample, class)
    lab2d = labels_i32.reshape(a_rows, 128)

    # Constant label-expansion matrix: E[j, q] = 1 iff j == q // 2.
    j_ids = jnp.arange(128, dtype=jnp.int32)[:, None]
    q_ids = jnp.arange(256, dtype=jnp.int32)[None, :]
    expand_mat = (q_ids // 2 == j_ids).astype(jnp.bfloat16)   # (128, 256)

    # ~2 MiB f32 logits tiles; granule of 16 rows keeps bf16 blocks legal.
    if a_rows <= tile_rows_max:
        tile_rows = a_rows
    else:
        tile_rows = max(16, (int(tile_rows_max) // 16) * 16)
        tile_rows = min(tile_rows, a_rows)
    grid = pl.cdiv(a_rows, tile_rows)

    kernel = functools.partial(
        _sce2_kernel, alpha=float(alpha), beta=float(beta),
        valid_rows=a_rows, tile_rows=tile_rows)

    partials = pl.pallas_call(
        kernel,
        out_shape=jax.ShapeDtypeStruct((grid, 1), jnp.float32),
        grid=(grid,),
        in_specs=[
            pl.BlockSpec((tile_rows, 256), lambda i: (i, 0)),
            pl.BlockSpec((tile_rows, 128), lambda i: (i, 0)),
            pl.BlockSpec((128, 256), lambda i: (0, 0)),
        ],
        out_specs=pl.BlockSpec((1, 1), lambda i: (i, 0),
                               memory_space=pltpu.MemorySpace.SMEM),
        compiler_params=pltpu.CompilerParams(
            # "parallel": independent per-step partials; lets megacore chips
            # split the axis across TensorCores (kernel is HBM-bound anyway).
            dimension_semantics=("parallel",),
            vmem_limit_bytes=_VMEM_LIMIT),
    )(pred2d, lab2d, expand_mat)

    return jnp.sum(partials) / jnp.float32(n)


# ---------------------------------------------------------------------------
# General path: arbitrary num_classes (rare); lane-dense transposed layout.
# ---------------------------------------------------------------------------
def _sce_general_kernel(pred_ref, labels_ref, out_ref, *,
                        alpha, beta, n_valid, tile_n):
    i = pl.program_id(0)
    logits = pred_ref[...].astype(jnp.float32)        # (C, T), batch on lanes
    labels = labels_ref[...]                          # (1, T) int32
    c, t = logits.shape

    m = jnp.max(logits, axis=0, keepdims=True)
    z = logits - m
    ez = jnp.exp(z)
    sum_ez = jnp.sum(ez, axis=0, keepdims=True)
    log_sum = jnp.log(sum_ez)

    class_ids = jax.lax.broadcasted_iota(jnp.int32, (c, t), 0)
    one_hot = class_ids == labels                     # (C, T)

    z_label = jnp.sum(jnp.where(one_hot, z, 0.0), axis=0, keepdims=True)
    ce_n = log_sum - z_label                          # (1, T)

    p = jnp.maximum(ez * pl.reciprocal(sum_ez, approx=False), 1e-7)
    p_nontarget = jnp.sum(jnp.where(one_hot, 0.0, p), axis=0, keepdims=True)
    rce_n = _RCE_K * p_nontarget

    contrib = alpha * ce_n + beta * rce_n
    col = i * tile_n + jax.lax.broadcasted_iota(jnp.int32, (1, t), 1)
    contrib = jnp.where(col < n_valid, contrib, 0.0)
    out_ref[0, 0] = jnp.sum(contrib)


def _sce_loss_general(pred, labels, alpha, beta):
    n, c = pred.shape
    n_pad = _round_up(n, 128)
    pred_t = jnp.transpose(pred)                      # (C, N): batch on lanes
    labels_row = labels.astype(jnp.int32).reshape(1, n)
    if n_pad != n:
        pred_t = jnp.pad(pred_t, ((0, 0), (0, n_pad - n)))
        labels_row = jnp.pad(labels_row, ((0, 0), (0, n_pad - n)))

    # ~2 MiB f32 logits tile, lane-dense and a multiple of 128 columns.
    tile_n = min(n_pad, max(128, (2 * 1024 * 1024 // (4 * c)) // 128 * 128))
    grid = pl.cdiv(n_pad, tile_n)

    kernel = functools.partial(
        _sce_general_kernel, alpha=float(alpha), beta=float(beta),
        n_valid=n, tile_n=tile_n)

    partials = pl.pallas_call(
        kernel,
        out_shape=jax.ShapeDtypeStruct((grid, 1), jnp.float32),
        grid=(grid,),
        in_specs=[
            pl.BlockSpec((c, tile_n), lambda i: (0, i)),
            pl.BlockSpec((1, tile_n), lambda i: (0, i)),
        ],
        out_specs=pl.BlockSpec((1, 1), lambda i: (i, 0),
                               memory_space=pltpu.MemorySpace.SMEM),
        compiler_params=pltpu.CompilerParams(
            dimension_semantics=("parallel",),
            vmem_limit_bytes=_VMEM_LIMIT),
    )(pred_t, labels_row)

    return jnp.sum(partials) / jnp.float32(n)


# ---------------------------------------------------------------------------
# Public entry point (mirrors SCELoss.forward).
# ---------------------------------------------------------------------------
def sce_loss(pred, labels, *, alpha=1.0, beta=1.0, num_classes=2,
             tile_rows_max=2048):
    """Pallas TPU implementation of SCELoss.forward.

    pred:   (N, num_classes) float logits (any float dtype; cast in-kernel)
    labels: (N,) integer class ids
    returns scalar float32 loss
    """
    assert pred.ndim == 2 and pred.shape[1] == num_classes
    if num_classes == 2:
        return _sce_loss_binary(pred, labels, alpha, beta, tile_rows_max)
    return _sce_loss_general(pred, labels, alpha, beta)


def _sce_loss_ref(pred, labels, *, alpha=1.0, beta=1.0, num_classes=2):
    """Pure-JAX reference mirroring the PyTorch module."""
    pred = pred.astype(jnp.float32)
    log_sm = jax.nn.log_softmax(pred, axis=1)
    one_hot = jax.nn.one_hot(labels, num_classes, dtype=jnp.float32)
    ce = -jnp.mean(jnp.sum(one_hot * log_sm, axis=1))
    p = jnp.clip(jax.nn.softmax(pred, axis=1), 1e-7, 1.0)
    rce = -jnp.sum(p * jnp.log(jnp.clip(one_hot, 1e-4, 1.0)), axis=1)
    return alpha * ce + beta * jnp.mean(rce)


if __name__ == "__main__":
    key = jax.random.PRNGKey(0)
    k1, k2, k3, k4, k5, k6, k7, k8 = jax.random.split(key, 8)

    # 1) Module defaults: num_classes=2, small batch.
    n1, c1 = 8, 2
    pred1 = jax.random.normal(k1, (n1, c1), dtype=jnp.float32)
    lab1 = jax.random.randint(k2, (n1,), 0, c1, dtype=jnp.int32)
    out1 = sce_loss(pred1, lab1, alpha=1.0, beta=1.0, num_classes=c1)
    jax.block_until_ready(out1)
    ref1 = _sce_loss_ref(pred1, lab1, alpha=1.0, beta=1.0, num_classes=c1)
    assert jnp.allclose(out1, ref1, rtol=1e-5, atol=1e-4), (out1, ref1)

    # 2) Unaligned batch -> pad path, multi-step grid with a partial last block.
    n2 = 2510
    pred2 = jax.random.normal(k3, (n2, 2), dtype=jnp.float32)
    lab2 = jax.random.randint(k4, (n2,), 0, 2, dtype=jnp.int32)
    out2 = sce_loss(pred2, lab2, alpha=0.5, beta=2.0, num_classes=2,
                    tile_rows_max=16)
    jax.block_until_ready(out2)
    ref2 = _sce_loss_ref(pred2, lab2, alpha=0.5, beta=2.0, num_classes=2)
    assert jnp.allclose(out2, ref2, rtol=1e-5, atol=1e-4), (out2, ref2)

    # 3) bf16 logits, default tiling (native dtype goes straight into the kernel).
    n3 = 777
    pred3 = jax.random.normal(k5, (n3, 2), dtype=jnp.float32).astype(jnp.bfloat16)
    lab3 = jax.random.randint(k6, (n3,), 0, 2, dtype=jnp.int32)
    out3 = sce_loss(pred3, lab3)
    jax.block_until_ready(out3)
    ref3 = _sce_loss_ref(pred3, lab3)
    assert jnp.allclose(out3, ref3, rtol=1e-5, atol=1e-4), (out3, ref3)

    # 4) General num_classes != 2 fallback path.
    n4, c4 = 300, 4
    pred4 = jax.random.normal(k7, (n4, c4), dtype=jnp.float32)
    lab4 = jax.random.randint(k8, (n4,), 0, c4, dtype=jnp.int32)
    out4 = sce_loss(pred4, lab4, alpha=1.5, beta=0.7, num_classes=c4)
    jax.block_until_ready(out4)
    ref4 = _sce_loss_ref(pred4, lab4, alpha=1.5, beta=0.7, num_classes=c4)
    assert jnp.allclose(out4, ref4, rtol=1e-5, atol=1e-4), (out4, ref4)

    print("KERNEL_OK")
</pallas_src>

<mosaic_0001>
module attributes {stable_mosaic.version = 11 : i64} {
  func.func @_sce2_kernel(%arg0: i32, %arg1: memref<1x256xf32, #tpu.memory_space<vmem>>, %arg2: memref<1x128xi32, #tpu.memory_space<vmem>>, %arg3: memref<128x256xbf16, #tpu.memory_space<vmem>>, %arg4: memref<1x1xf32, #tpu.memory_space<smem>>) attributes {dimension_semantics = [#tpu.dimension_semantics<parallel>], iteration_bounds = array<i64: 1>, scalar_prefetch = 0 : i64, scratch_operands = 0 : i64, tpu.core_type = #tpu.core_type<tc>, window_params = [{transform_indices = @transform_0, window_bounds = array<i64: 1, 256>}, {transform_indices = @transform_1, window_bounds = array<i64: 1, 128>}, {pipeline_mode = #tpu.pipeline_mode<synchronous>, transform_indices = @transform_2, window_bounds = array<i64: 128, 256>}, {transform_indices = @transform_3, window_bounds = array<i64: 1, 1>}]} {
    %c0 = arith.constant 0 : index
    %c0_0 = arith.constant 0 : index
    %0 = vector.load %arg1[%c0, %c0_0] : memref<1x256xf32, #tpu.memory_space<vmem>>, vector<1x256xf32>
    %c0_1 = arith.constant 0 : index
    %c0_2 = arith.constant 0 : index
    %1 = vector.load %arg2[%c0_1, %c0_2] : memref<1x128xi32, #tpu.memory_space<vmem>>, vector<1x128xi32>
    %2 = arith.sitofp %1 : vector<1x128xi32> to vector<1x128xf32>
    %3 = arith.truncf %2 : vector<1x128xf32> to vector<1x128xbf16>
    %c0_3 = arith.constant 0 : index
    %c0_4 = arith.constant 0 : index
    %4 = vector.load %arg3[%c0_3, %c0_4] : memref<128x256xbf16, #tpu.memory_space<vmem>>, vector<128x256xbf16>
    %cst = arith.constant dense<0.000000e+00> : vector<1x256xf32>
    %5 = tpu.matmul %3, %4, %cst {dimension_numbers = #tpu.dot_dimension_numbers<[1], [0], [0], [1], [0, 0, 1, 1], [], []>} : vector<1x128xbf16>, vector<128x256xbf16>, vector<1x256xf32> -> vector<1x256xf32>
    %c1_i32 = arith.constant 1 : i32
    %6 = arith.muli %arg0, %c1_i32 : i32
    %7 = tpu.iota {dimensions = array<i32: 0>} : vector<1x1xi32>
    %8 = vector.broadcast %6 : i32 to vector<1x1xi32>
    %9 = arith.addi %8, %7 : vector<1x1xi32>
    %c1_i32_5 = arith.constant 1 : i32
    %10 = vector.broadcast %c1_i32_5 : i32 to vector<1x1xi32>
    %11 = arith.cmpi slt, %9, %10 : vector<1x1xi32>
    %12 = tpu.iota {dimensions = array<i32: 1>} : vector<1x128xi32>
    %c1_i32_6 = arith.constant 1 : i32
    %13 = vector.broadcast %c1_i32_6 : i32 to vector<1x128xi32>
    %14 = arith.andi %12, %13 : vector<1x128xi32>
    %c1_i32_7 = arith.constant 1 : i32
    %15 = vector.broadcast %c1_i32_7 : i32 to vector<1x128xi32>
    %16 = arith.addi %12, %15 : vector<1x128xi32>
    %c2_i32 = arith.constant 2 : i32
    %17 = vector.broadcast %c2_i32 : i32 to vector<1x128xi32>
    %18 = arith.muli %17, %14 : vector<1x128xi32>
    %19 = arith.subi %16, %18 : vector<1x128xi32>
    %c127_i32 = arith.constant 127 : i32
    %20 = tpu.dynamic_rotate %12 by %c127_i32 dim 1 : vector<1x128xi32>, i32 -> vector<1x128xi32>
    %21 = arith.cmpi eq, %20, %19 : vector<1x128xi32>
    %22 = arith.sitofp %14 : vector<1x128xi32> to vector<1x128xf32>
    %23 = vector.extract_strided_slice %0 {offsets = [0, 0], sizes = [1, 128], strides = [1, 1]} : vector<1x256xf32> to vector<1x128xf32>
    %24 = vector.extract_strided_slice %5 {offsets = [0, 0], sizes = [1, 128], strides = [1, 1]} : vector<1x256xf32> to vector<1x128xf32>
    %c127_i32_8 = arith.constant 127 : i32
    %25 = tpu.dynamic_rotate %23 by %c127_i32_8 dim 1 : vector<1x128xf32>, i32 -> vector<1x128xf32>
    %c1_i32_9 = arith.constant 1 : i32
    %26 = tpu.dynamic_rotate %23 by %c1_i32_9 dim 1 : vector<1x128xf32>, i32 -> vector<1x128xf32>
    %27 = arith.select %21, %25, %26 : vector<1x128xi1>, vector<1x128xf32>
    %28 = arith.subf %27, %23 : vector<1x128xf32>
    %29 = math.absf %28 : vector<1x128xf32>
    %cst_10 = arith.constant 0.000000e+00 : f32
    %30 = vector.broadcast %cst_10 : f32 to vector<1x128xf32>
    %31 = arith.subf %30, %29 : vector<1x128xf32>
    %32 = math.exp %31 : vector<1x128xf32>
    %cst_11 = arith.constant 1.000000e+00 : f32
    %33 = vector.broadcast %cst_11 : f32 to vector<1x128xf32>
    %34 = arith.addf %33, %32 : vector<1x128xf32>
    %35 = math.log %34 : vector<1x128xf32>
    %cst_12 = arith.constant 0.000000e+00 : f32
    %36 = vector.broadcast %cst_12 : f32 to vector<1x128xf32>
    %37 = arith.maximumf %28, %36 : vector<1x128xf32>
    %38 = arith.addf %37, %35 : vector<1x128xf32>
    %39 = arith.subf %38, %28 : vector<1x128xf32>
    %cst_13 = arith.constant 0.000000e+00 : f32
    %40 = vector.broadcast %cst_13 : f32 to vector<1x128xf32>
    %41 = arith.subf %40, %39 : vector<1x128xf32>
    %42 = math.exp %41 : vector<1x128xf32>
    %cst_14 = arith.constant 1.000000e+00 : f32
    %43 = vector.broadcast %cst_14 : f32 to vector<1x128xf32>
    %44 = arith.mulf %43, %38 : vector<1x128xf32>
    %cst_15 = arith.constant 1.000000e-07 : f32
    %45 = vector.broadcast %cst_15 : f32 to vector<1x128xf32>
    %46 = arith.maximumf %42, %45 : vector<1x128xf32>
    %cst_16 = arith.constant 9.21034049 : f32
    %47 = vector.broadcast %cst_16 : f32 to vector<1x128xf32>
    %48 = arith.mulf %47, %46 : vector<1x128xf32>
    %49 = arith.addf %44, %48 : vector<1x128xf32>
    %50 = arith.cmpf oeq, %24, %22 : vector<1x128xf32>
    %51 = vector.broadcast %11 : vector<1x1xi1> to vector<1x128xi1>
    %52 = arith.andi %50, %51 : vector<1x128xi1>
    %cst_17 = arith.constant 0.000000e+00 : f32
    %53 = vector.broadcast %cst_17 : f32 to vector<1x128xf32>
    %54 = arith.select %52, %49, %53 : vector<1x128xi1>, vector<1x128xf32>
    %55 = vector.shape_cast %54 : vector<1x128xf32> to vector<1x1x128xf32>
    %cst_18 = arith.constant dense<0.000000e+00> : vector<1xf32>
    %56 = vector.multi_reduction <add>, %55, %cst_18 [1, 2] : vector<1x1x128xf32> to vector<1xf32>
    %57 = vector.shape_cast %56 : vector<1xf32> to vector<1x1x1xf32>
    %58 = vector.extract %57[0, 0, 0] : f32 from vector<1x1x1xf32>
    %cst_19 = arith.constant 0.000000e+00 : f32
    %59 = arith.addf %cst_19, %58 : f32
    %60 = vector.extract_strided_slice %0 {offsets = [0, 128], sizes = [1, 128], strides = [1, 1]} : vector<1x256xf32> to vector<1x128xf32>
    %61 = vector.extract_strided_slice %5 {offsets = [0, 128], sizes = [1, 128], strides = [1, 1]} : vector<1x256xf32> to vector<1x128xf32>
    %c127_i32_20 = arith.constant 127 : i32
    %62 = tpu.dynamic_rotate %60 by %c127_i32_20 dim 1 : vector<1x128xf32>, i32 -> vector<1x128xf32>
    %c1_i32_21 = arith.constant 1 : i32
    %63 = tpu.dynamic_rotate %60 by %c1_i32_21 dim 1 : vector<1x128xf32>, i32 -> vector<1x128xf32>
    %64 = arith.select %21, %62, %63 : vector<1x128xi1>, vector<1x128xf32>
    %65 = arith.subf %64, %60 : vector<1x128xf32>
    %66 = math.absf %65 : vector<1x128xf32>
    %cst_22 = arith.constant 0.000000e+00 : f32
    %67 = vector.broadcast %cst_22 : f32 to vector<1x128xf32>
    %68 = arith.subf %67, %66 : vector<1x128xf32>
    %69 = math.exp %68 : vector<1x128xf32>
    %cst_23 = arith.constant 1.000000e+00 : f32
    %70 = vector.broadcast %cst_23 : f32 to vector<1x128xf32>
    %71 = arith.addf %70, %69 : vector<1x128xf32>
    %72 = math.log %71 : vector<1x128xf32>
    %cst_24 = arith.constant 0.000000e+00 : f32
    %73 = vector.broadcast %cst_24 : f32 to vector<1x128xf32>
    %74 = arith.maximumf %65, %73 : vector<1x128xf32>
    %75 = arith.addf %74, %72 : vector<1x128xf32>
    %76 = arith.subf %75, %65 : vector<1x128xf32>
    %cst_25 = arith.constant 0.000000e+00 : f32
    %77 = vector.broadcast %cst_25 : f32 to vector<1x128xf32>
    %78 = arith.subf %77, %76 : vector<1x128xf32>
    %79 = math.exp %78 : vector<1x128xf32>
    %cst_26 = arith.constant 1.000000e+00 : f32
    %80 = vector.broadcast %cst_26 : f32 to vector<1x128xf32>
    %81 = arith.mulf %80, %75 : vector<1x128xf32>
    %cst_27 = arith.constant 1.000000e-07 : f32
    %82 = vector.broadcast %cst_27 : f32 to vector<1x128xf32>
    %83 = arith.maximumf %79, %82 : vector<1x128xf32>
    %cst_28 = arith.constant 9.21034049 : f32
    %84 = vector.broadcast %cst_28 : f32 to vector<1x128xf32>
    %85 = arith.mulf %84, %83 : vector<1x128xf32>
    %86 = arith.addf %81, %85 : vector<1x128xf32>
    %87 = arith.cmpf oeq, %61, %22 : vector<1x128xf32>
    %88 = vector.broadcast %11 : vector<1x1xi1> to vector<1x128xi1>
    %89 = arith.andi %87, %88 : vector<1x128xi1>
    %cst_29 = arith.constant 0.000000e+00 : f32
    %90 = vector.broadcast %cst_29 : f32 to vector<1x128xf32>
    %91 = arith.select %89, %86, %90 : vector<1x128xi1>, vector<1x128xf32>
    %92 = vector.shape_cast %91 : vector<1x128xf32> to vector<1x1x128xf32>
    %cst_30 = arith.constant dense<0.000000e+00> : vector<1xf32>
    %93 = vector.multi_reduction <add>, %92, %cst_30 [1, 2] : vector<1x1x128xf32> to vector<1xf32>
    %94 = vector.shape_cast %93 : vector<1xf32> to vector<1x1x1xf32>
    %95 = vector.extract %94[0, 0, 0] : f32 from vector<1x1x1xf32>
    %96 = arith.addf %59, %95 : f32
    %c0_31 = arith.constant 0 : index
    %c0_32 = arith.constant 0 : index
    %97 = memref.load %arg4[%c0_31, %c0_32] : memref<1x1xf32, #tpu.memory_space<smem>>
    memref.store %96, %arg4[%c0_31, %c0_32] : memref<1x1xf32, #tpu.memory_space<smem>>
    return
  }
  func.func @transform_0(%arg0: i32) -> (i32, i32) {
    %c0_i32 = arith.constant 0 : i32
    %c0_i32_0 = arith.constant 0 : i32
    return %arg0, %c0_i32 : i32, i32
  }
  func.func @transform_1(%arg0: i32) -> (i32, i32) {
    %c0_i32 = arith.constant 0 : i32
    %c0_i32_0 = arith.constant 0 : i32
    return %arg0, %c0_i32 : i32, i32
  }
  func.func @transform_2(%arg0: i32) -> (i32, i32) {
    %c0_i32 = arith.constant 0 : i32
    %c0_i32_0 = arith.constant 0 : i32
    %c0_i32_1 = arith.constant 0 : i32
    return %c0_i32, %c0_i32_0 : i32, i32
  }
  func.func @transform_3(%arg0: i32) -> (i32, i32) {
    %c0_i32 = arith.constant 0 : i32
    %c0_i32_0 = arith.constant 0 : i32
    return %arg0, %c0_i32 : i32, i32
  }
}

</mosaic_0001>

<bundles_post_ra>
// kernel: tpu_custom_call.1
= control target key start
LH: loop header
LB: loop body
LE: loop exit
PB: predicated region body
PF: predicated region fallthrough
CT: control target
= control target key end

     0   :  { %8 = vsyncpa [#allocation3], 0  ;;  %s503_s0 = inlined_call_operand.hbm [shape: f32[1,256], index: 0, kind: input, shape index: {}]   ;;  %s504_s1 = inlined_call_operand.vmem [shape: s32[1,128], index: 1, kind: input, shape index: {}]   ;;  %s505_s2 = inlined_call_operand.hbm [shape: bf16[128,256], index: 2, kind: input, shape index: {}]   ;;  %s506_s3 = inlined_call_operand.hbm [shape: f32[1,1], index: 3, kind: output, shape index: {}]  }
   0x1   :  { %9 = vsyncpa [#allocation6], 0 }
   0x2   :  { %10 = vsyncpa [#allocation4], 0  ;;  %s420_s12 = smov [#allocation2]   ;;  %s421_s14 = smov [#allocation5]  }
   0x3   :  { %s17_s13 = sshll.u32 %s420_s12, 4  ;;  %s28_s15 = sshll.u32 %s421_s14, 4  ;;  %s18_s13 = int_to_ptr.vmem [resolvable:$true] %s17_s13  ;;  %s448_s15 = int_to_ptr.vmem [resolvable:$true] %s28_s15 }
   0x4   :  { %s360_s18 = scalar_lea.hbm %s503_s0, 32 }
   0x5   :  { %p361_p0 = scmp.ne.s32.totalorder %s503_s0, %s360_s18  ;;  %p364_p1 = scmp.lt.u32.totalorder %s360_s18, %s503_s0 }
   0x7   :  { %p366_p2 = pnand %p364_p1, %p361_p0 }
   0x9   :  { %369 = shalt.err (!%p366_p2)
}
   0xa   :  { %s370_s23 = scalar_lea.vmem %s18_s13, 32  ;;  %p375_p4 = scmp.lt.s32.totalorder %s18_s13, %s18_s13 }
   0xb   :  { %p371_p3 = scmp.ne.s32.totalorder %s18_s13, %s370_s23  ;;  %p376_p5 = scmp.lt.s32.totalorder %s370_s23, %s370_s23 }
   0xd   :  { %p377_p6 = por %p376_p5, %p375_p4 }
   0xf   :  { %p378_p7 = pnand %p377_p6, %p371_p3 }
  0x11   :  { %381 = shalt.err (!%p378_p7)
}
  0x12   :  { %20 = dma.hbm_to_vmem [thread:$0]  %s503_s0, 32, %s18_s13, [#allocation3]  }
  0x13   :  { %s382_s28 = scalar_lea.hbm %s505_s2, 2048 }
  0x14   :  { %p383_p8 = scmp.ne.s32.totalorder %s505_s2, %s382_s28  ;;  %p386_p9 = scmp.lt.u32.totalorder %s382_s28, %s505_s2 }
  0x16   :  { %p388_p10 = pnand %p386_p9, %p383_p8 }
  0x18   :  { %391 = shalt.err (!%p388_p10)
}
  0x19   :  { %s392_s6 = scalar_lea.vmem %s448_s15, 2048  ;;  %p397_p12 = scmp.lt.s32.totalorder %s448_s15, %s448_s15 }
  0x1a   :  { %p393_p11 = scmp.ne.s32.totalorder %s448_s15, %s392_s6  ;;  %p398_p13 = scmp.lt.s32.totalorder %s392_s6, %s392_s6 }
  0x1c   :  { %p399_p0 = por %p398_p13, %p397_p12 }
  0x1e   :  { %p400_p1 = pnand %p399_p0, %p393_p11 }
  0x20   :  { %403 = shalt.err (!%p400_p1)
}
  0x21   :  { %s422_s0 = smov 128   ;;  %s423_s7 = smov 8  }
  0x22   :  { %34 = dma.hbm_to_vmem [thread:$0]  %s505_s2, 2048, %s448_s15, [#allocation6], %s422_s0, %s422_s0, %s423_s7  }
  0x23   :  { %414 = dma.done.wait [#allocation3], 32  }
  0x24   :  { %415 = vsyncadd [#allocation3], 4294967264 }
  0x25   :  { %416 = dma.done.wait [#allocation6], 2048  }
  0x26   :  { %417 = vsyncadd [#allocation6], 4294965248  ;;  %v183_v0 = vlaneseq  ;;  %v424_v1 = vmov 0   ;;  %s425_s10 = smov 127   ;;  %v324_v4 = vld [vmem:[#allocation5 + $0x4] ss:$8 sps:$4 sm:$0xff]  }
  0x27   :  { %174 = vmatprep.mubr.bf16.mxu0 %v424_v1  ;;  %v326_v5 = vld [vmem:[#allocation5] ss:$8 sps:$4 sm:$0xff]   ;;  %142 = vmatprep.subr.bf16.mxu0 %v324_v4  ;;  %v327_v7 = vld [vmem:[#allocation5 + $0x14] ss:$8 sps:$4 sm:$0xff]   ;;  %v329_v8 = vld [vmem:[#allocation5 + $0x10] ss:$8 sps:$4 sm:$0xff]  }
  0x28   :  { %v479_v2 = vand.u32 127, %v183_v0  ;;  %v482_v3 = vshrl.u32 %v183_v0, 7  ;;  %143 = vmatpush1.bf16.msra.mxu0 %v326_v5  ;;  %v330_v9 = vld [vmem:[#allocation5 + $0x24] ss:$8 sps:$4 sm:$0xff]   ;;  %v42_v10 = vld [vmem:[#allocation2] sm:$0x3] }
  0x29   :  { %144 = vmatprep.subr.bf16.mxu0 %v327_v7  ;;  %s426_s2 = smov 1   ;;  %v332_v12 = vld [vmem:[#allocation5 + $0x20] ss:$8 sps:$4 sm:$0xff]   ;;  %v333_v13 = vld [vmem:[#allocation5 + $0x34] ss:$8 sps:$4 sm:$0xff]   ;;  %vm225_vm3 = vcmask 1040384  }
  0x2a   :  { %194 = vrot.lane.b32.xlu0 %v479_v2, %s425_s10  ;;  %v240_v6 = vsub.s32 1, %v482_v3  ;;  %200 = vrot.lane.b32.xlu1 %v42_v10, %s426_s2  ;;  %v335_v14 = vld [vmem:[#allocation5 + $0x30] ss:$8 sps:$4 sm:$0xff]   ;;  %v336_v15 = vld [vmem:[#allocation5 + $0x44] ss:$8 sps:$4 sm:$0xff]   ;;  %v190_v26 = vand.u32 1, %v479_v2 }
  0x2b   :  { %v338_v16 = vld [vmem:[#allocation5 + $0x40] ss:$8 sps:$4 sm:$0xff]   ;;  %v339_v17 = vld [vmem:[#allocation5 + $0x54] ss:$8 sps:$4 sm:$0xff]   ;;  %v341_v18 = vld [vmem:[#allocation5 + $0x50] ss:$8 sps:$4 sm:$0xff]  }
  0x2c   :  { %v241_v11 = vrot.slane %v42_v10, %v240_v6  ;;  %145 = vmatpush1.bf16.msra.mxu0 %v329_v8  ;;  %v342_v19 = vld [vmem:[#allocation5 + $0x64] ss:$8 sps:$4 sm:$0xff]   ;;  %v344_v20 = vld [vmem:[#allocation5 + $0x60] ss:$8 sps:$4 sm:$0xff]   ;;  %v43_v21 = vld [vmem:[%s504_s1] sm:$0x1]  ;;  %v197_v4 = vcvt.s32.f32 %v190_v26 }
  0x2d   :  { %146 = vmatprep.subr.bf16.mxu0 %v330_v9  ;;  %v345_v22 = vld [vmem:[#allocation5 + $0x74] ss:$8 sps:$4 sm:$0xff]   ;;  %v44_v23 = vcvt.s32.f32 %v43_v21  ;;  %v347_v24 = vld [vmem:[#allocation5 + $0x70] ss:$8 sps:$4 sm:$0xff]   ;;  %v191_v28 = vadd.s32 1, %v479_v2  ;;  %v192_v29 = vmul.u32 2, %v190_v26 }
  0x2e   :  { %198 = vrot.lane.b32.xlu0 %v42_v10, %s425_s10  ;;  %243 = vrot.lane.b32.xlu1 %v241_v11, %s425_s10  ;;  %vm187_vm1 = vcmp.lt.s32.totalorder %v482_v3, 1  ;;  %s404_s17 = scalar_lea.hbm %s506_s3, 16 }
  0x2f   :  { %v45_v25 = vpack.c.bf16 %v44_v23, %v44_v23  ;;  %v193_v32 = vsub.s32 %v191_v28, %v192_v29  ;;  %p405_p2 = scmp.ne.s32.totalorder %s506_s3, %s404_s17  ;;  %p408_p3 = scmp.lt.u32.totalorder %s404_s17, %s506_s3 }
  0x30   :  { %147 = vmatpush1.bf16.msra.mxu0 %v332_v12 }
  0x31   :  { %148 = vmatprep.subr.bf16.mxu0 %v333_v13  ;;  %p410_p4 = pnand %p408_p3, %p405_p2 }
  0x32   :  { %245 = vrot.lane.b32.xlu0 %v241_v11, %s426_s2 }
  0x34   :  { %149 = vmatpush1.bf16.msra.mxu0 %v335_v14 }
  0x35   :  { %150 = vmatprep.subr.bf16.mxu0 %v336_v15 }
  0x38   :  { %151 = vmatpush1.bf16.msra.mxu0 %v338_v16 }
  0x39   :  { %152 = vmatprep.subr.bf16.mxu0 %v339_v17 }
  0x3c   :  { %153 = vmatpush1.bf16.msra.mxu0 %v341_v18 }
  0x3d   :  { %154 = vmatprep.subr.bf16.mxu0 %v342_v19 }
  0x40   :  { %155 = vmatpush1.bf16.msra.mxu0 %v344_v20 }
  0x41   :  { %156 = vmatprep.subr.bf16.mxu0 %v345_v22 }
  0x44   :  { %157 = vmatpush1.bf16.msra.mxu0 %v347_v24 }
  0x47   :  { %175 = vmatmul.mubr.bf16.vlgmr.msra.gmra.mrb[0].mxu0 %v45_v25 }
  0x9c   :  { %v195_v27 = vpop.permute.xlu0 %194  ;;  %v201_v30 = vpop.permute.xlu1 %200 }
  0x9d   :  { %vm196_vm0 = vcmp.eq.s32.totalorder %v195_v27, %v193_v32 }
  0xa0   :  { %v199_v31 = vpop.permute.xlu0 %198  ;;  %v244_v34 = vpop.permute.xlu1 %243 }
  0xa1   :  { %v202_v35 = vsel %vm196_vm0, %v199_v31, %v201_v30 }
  0xa2   :  { %v203_v37 = vsub.f32 %v202_v35, %v42_v10 }
  0xa4   :  { %v246_v33 = vpop.permute.xlu0 %245  ;;  %v204_v39 = vand.u32 2147483647, %v203_v37  ;;  %v211_v51 = vmax.f32 %v203_v37, 0.0 }
  0xa5   :  { %v247_v36 = vsel %vm196_vm0, %v244_v34, %v246_v33 }
  0xa6   :  { %v248_v38 = vsub.f32 %v247_v36, %v241_v11  ;;  %v205_v41 = vsub.f32 0.0, %v204_v39 }
  0xa8   :  { %v249_v40 = vand.u32 2147483647, %v248_v38  ;;  %v206_v43 = vmul.f32 1.442695, %v205_v41  ;;  %v256_v53 = vmax.f32 %v248_v38, 0.0 }
  0xaa   :  { %v250_v42 = vsub.f32 0.0, %v249_v40  ;;  %348 = vpow2.f32 %v206_v43 }
  0xac   :  { %v251_v44 = vmul.f32 1.442695, %v250_v42 }
  0xae   :  { %350 = vpow2.f32 %v251_v44 }
  0xb4   :  { %v349_v45 = vpop.eup %348 }
  0xb5   :  { %v208_v47 = vadd.f32 1.0, %v349_v45 }
  0xb7   :  { %352 = vlog2.f32 %v208_v47 }
  0xb8   :  { %v351_v46 = vpop.eup %350 }
  0xb9   :  { %v253_v48 = vadd.f32 1.0, %v351_v46 }
  0xbb   :  { %354 = vlog2.f32 %v253_v48 }
  0xc1   :  { %v353_v49 = vpop.eup %352 }
  0xc2   :  { %v210_v52 = vmul.f32 0.6931472, %v353_v49 }
  0xc4   :  { %v212_v55 = vadd.f32 %v211_v51, %v210_v52 }
  0xc5   :  { %v355_v50 = vpop.eup %354 }
  0xc6   :  { %v255_v54 = vmul.f32 0.6931472, %v355_v50  ;;  %v213_v57 = vsub.f32 %v212_v55, %v203_v37 }
  0xc8   :  { %v257_v56 = vadd.f32 %v256_v53, %v255_v54  ;;  %v214_v59 = vsub.f32 0.0, %v213_v57 }
  0xca   :  { %v258_v58 = vsub.f32 %v257_v56, %v248_v38  ;;  %v215_v61 = vmul.f32 1.442695, %v214_v59 }
  0xcc   :  { %v259_v60 = vsub.f32 0.0, %v258_v58  ;;  %356 = vpow2.f32 %v215_v61 }
  0xce   :  { %v260_v62 = vmul.f32 1.442695, %v259_v60 }
  0xd0   :  { %358 = vpow2.f32 %v260_v62 }
  0xd6   :  { %v357_v63 = vpop.eup %356 }
  0xd7   :  { %v217_v1 = vmax.f32 %v357_v63, 1e-07 }
  0xd9   :  { %v218_v5 = vmul.f32 9.2103405, %v217_v1 }
  0xda   :  { %v359_v0 = vpop.eup %358 }
  0xdb   :  { %v262_v2 = vmax.f32 %v359_v0, 1e-07  ;;  %v219_v9 = vadd.f32 %v218_v5, %v212_v55 }
  0xdd   :  { %v263_v6 = vmul.f32 9.2103405, %v262_v2 }
  0xdf   :  { %v264_v11 = vadd.f32 %v263_v6, %v257_v56 }
 0x11a   :  { %v176_v7 = vpop.f32.mrb[0].mxu0 }
 0x11b   :  { %vm220_vm2 = vcmp.eq.f32.partialorder %v176_v7, %v197_v4  ;;  %v178_v8 = vpop.f32.mrb[1].mxu0 }
 0x11c   :  { %vm223_vm4 = vmand %vm220_vm2, %vm187_vm1  ;;  %vm265_vm5 = vcmp.eq.f32.partialorder %v178_v8, %v197_v4  ;;  %v180_v10 = vpop.f32.mrb[2].mxu0 }
 0x11d   :  { %vm266_vm6 = vmand %vm265_vm5, %vm187_vm1  ;;  %v181_v12 = vpop.f32.mrb[3].mxu0  ;;  %v224_v13 = vsel %vm223_vm4, %v219_v9, 0.0 }
 0x11e   :  { %v226_v14 = vsel %vm225_vm3, %v224_v13, 0.0  ;;  %v267_v15 = vsel %vm266_vm6, %v264_v11, 0.0 }
 0x11f   :  { %227 = vadd.xlane.f32.xlu1 %v226_v14  ;;  %v268_v16 = vsel %vm225_vm3, %v267_v15, 0.0 }
 0x120   :  { %269 = vadd.xlane.f32.xlu0 %v268_v16 }
 0x1ac   :  { %v228_v17 = vpop.xlane.xlu1 %227 }
 0x1ad   :  { %v229_v18 = vrot.slane %v228_v17, 4  ;;  %v270_v3 = vpop.xlane.xlu0 %269 }
 0x1ae   :  { %v271_v19 = vrot.slane %v270_v3, 4 }
 0x1af   :  { %v230_v20 = vadd.f32 %v229_v18, %v228_v17 }
 0x1b0   :  { %v272_v21 = vadd.f32 %v271_v19, %v270_v3 }
 0x1b1   :  { %v231_v22 = vrot.slane %v230_v20, 2 }
 0x1b2   :  { %v273_v23 = vrot.slane %v272_v21, 2 }
 0x1b3   :  { %v232_v24 = vadd.f32 %v231_v22, %v230_v20 }
 0x1b4   :  { %v274_v25 = vadd.f32 %v273_v23, %v272_v21 }
 0x1b5   :  { %v233_v26 = vrot.slane %v232_v24, 1 }
 0x1b6   :  { %v275_v27 = vrot.slane %v274_v25, 1 }
 0x1b7   :  { %v234_v28 = vadd.f32 %v233_v26, %v232_v24 }
 0x1b8   :  { %v276_v29 = vadd.f32 %v275_v27, %v274_v25 }
 0x1b9   :  { %312 = vpush %v234_v28 }
 0x1ba   :  { %314 = vpush %v276_v29 }
 0x1ea   :  { %s313_s1 = spop %312 }
 0x1eb   :  { %s315_s13 = spop %314 }
 0x1ec   :  { %s278_s14 = sadd.f32 %s315_s13, %s313_s1 }
 0x1ee   :  { %280 = sst [smem:[#allocation7]] %s278_s14 }
 0x1ef   :  { %413 = shalt.err (!%p410_p4)
}
 0x1f0   :  { %s427_s22 = smov [#allocation7]  }
 0x1f1   :  { %288 = dma.smem_to_hbm %s427_s22, 16, %s506_s3, [#allocation4]  }
 0x1f2   :  { %418 = dma.done.wait [#allocation4], 16  }
 0x1f3   :  { %419 = vsyncadd [#allocation4], 4294967280 }
 0x1f4   :  { %292 = sfence }
 0x1f5   :  { %293 = vsyncpa [#allocation3], 1 }
 0x1f6   :  { %294 = vsyncpa [#allocation6], 1 }
 0x1f7   :  { %295 = vsyncpa [#allocation4], 1 }

</bundles_post_ra>
